<compile_context>
chip_gen: v7x
topology: tpu7x:2x2x1
jax: 0.10.0
libtpu: 0.0.40
codegen_flags: <defaults>
</compile_context>

<pallas_src>
import jax
import jax.numpy as jnp
from jax.experimental import pallas as pl
from jax.experimental.pallas import tpu as pltpu


def _round_up(x, m):
    return ((x + m - 1) // m) * m


def _cdiv(a, b):
    return -(-a // b)


def _chip_defaults():
    """Returns (tensorcores seen by a 'parallel' grid axis, default batch tile)."""
    try:
        kind = jax.devices()[0].device_kind.lower().replace(" ", "").replace("-", "")
    except Exception:
        return 1, 1024
    if "v7" in kind:
        return 2, 1024                      # v7x: 2 TensorCores per chip
    if ("v4" in kind or "v5p" in kind) and "lite" not in kind:
        return 2, 1024                      # megacore: 2 TCs behind one device
    if "v5lite" in kind or "v5e" in kind:
        return 1, 512                       # single TC, 1 vst slot: modest tiles
    return 1, 1024                          # v6e / unknown: single TC


def _pick_grid(batch, batch_tile, row_align, n_tc):
    """Pick (tile, n_tiles) for the batch axis."""
    max_tile = max(_round_up(int(batch_tile), row_align), row_align)
    n_tiles = max(1, _cdiv(batch, max_tile))
    if n_tc > 1 and batch >= 2 * row_align:
        # Feed both TensorCores: even step count >= 2 (balanced sharding).
        if n_tiles < 2:
            n_tiles = 2
        elif n_tiles % 2:
            n_tiles += 1
    tile = min(max_tile, _round_up(_cdiv(batch, n_tiles), row_align))
    n_tiles = _cdiv(batch, tile)            # never emit fully-empty grid steps
    return tile, n_tiles


def critic_mlp_kernel(s_ref, a_ref, w0s_ref, w0a_ref, b0_ref,
                      w1_ref, b1_ref, wo_ref, bo_ref, o_ref):
    """Fused Critic tile: q = relu(relu([s,a]@W0+b0)@W1+b1) @ Wo.T + bo."""
    f32 = jnp.float32

    # Layer 0: [s, a] @ W0 + b0 == s @ W0[:S] + a @ W0[S:] + b0 (concat fused
    # away in the wrapper; MXU accumulates in f32 via preferred_element_type).
    h0 = (jnp.dot(s_ref[...].astype(w0s_ref.dtype), w0s_ref[...],
                  preferred_element_type=f32)
          + jnp.dot(a_ref[...].astype(w0a_ref.dtype), w0a_ref[...],
                    preferred_element_type=f32)
          + b0_ref[...].astype(f32))
    h0 = jnp.maximum(h0, 0.0)

    # Layer 1 (cast activations to the weight dtype so bf16 weights hit the
    # native bf16 MXU path; no-op for f32).
    h1 = (jnp.dot(h0.astype(w1_ref.dtype), w1_ref[...],
                  preferred_element_type=f32)
          + b1_ref[...].astype(f32))
    h1 = jnp.maximum(h1, 0.0)

    # Output layer has out_features == 1: VPU multiply + lane reduction is far
    # cheaper than an MXU matmul with N=1.  bo comes from SMEM as a scalar.
    wo_row = wo_ref[...].astype(f32)                       # (1, h1) broadcast row
    q_col = jnp.sum(h1 * wo_row, axis=-1, keepdims=True) + bo_ref[0]   # (tile, 1)

    # Lane-dense store: one cheap XLU transpose, then a full-width row write.
    o_ref[...] = jnp.transpose(q_col).astype(o_ref.dtype)  # (1, tile)


def critic_forward(state, action, params, *, batch_tile=None):
    """Critic forward pass with a fused Pallas MLP kernel, tiled over batch.

    `state` is (B, state_dim), `action` is (B, action_dim).  Works with f32 or
    bf16 activations/weights (accumulation is always f32).  Any batch size is
    accepted: the ragged last tile is handled by Pallas and the extra rows are
    sliced off the lane-dense result.
    """
    w0, b0, w1, b1, wo, bo = params
    B, state_dim = state.shape
    action_dim = action.shape[1]
    h0_dim = w0.shape[1]
    h1_dim = w1.shape[1]
    assert w0.shape[0] == state_dim + action_dim

    # Fuse the concat: split W0 once in the wrapper (static slice, free).
    w0_s = w0[:state_dim]                 # (state_dim, h0)
    w0_a = w0[state_dim:]                 # (action_dim, h0)
    bo_smem = bo.reshape(-1).astype(jnp.float32)   # (1,) scalar bias -> SMEM

    # --- grid / tile selection ------------------------------------------------
    n_tc, default_tile = _chip_defaults()
    if batch_tile is None:
        batch_tile = default_tile
    # Sublane packing: 8 rows for 4-byte dtypes, 16 for bf16, 32 for 1-byte.
    row_align = {4: 8, 2: 16, 1: 32}.get(state.dtype.itemsize, 8)
    tile, n_tiles = _pick_grid(B, batch_tile, row_align, n_tc)

    # Weights/biases use constant index_maps, so the pipeline keeps them
    # resident in VMEM across grid steps (no per-step re-DMA of constants).
    # TODO(synk): pipeline_mode=pl.Buffered(1) on the constants would drop the
    # unused second buffer; skipped as it is irrelevant at these sizes.
    const = lambda shape: pl.BlockSpec(shape, lambda i: (0, 0))

    q = pl.pallas_call(
        critic_mlp_kernel,
        # Lane-dense output: one (1, tile) row per grid step.
        out_shape=jax.ShapeDtypeStruct((n_tiles, 1, tile), state.dtype),
        grid_spec=pltpu.PrefetchScalarGridSpec(
            num_scalar_prefetch=0,
            grid=(n_tiles,),
            in_specs=[
                pl.BlockSpec((tile, state_dim), lambda i: (i, 0)),   # state tile
                pl.BlockSpec((tile, action_dim), lambda i: (i, 0)),  # action tile
                const((state_dim, h0_dim)),     # W0[:state_dim]  (pre-transposed)
                const((action_dim, h0_dim)),    # W0[state_dim:]  (pre-transposed)
                const((1, h0_dim)),             # b0
                const((h0_dim, h1_dim)),        # W1              (pre-transposed)
                const((1, h1_dim)),             # b1
                const((1, h1_dim)),             # Wo  (PyTorch layout (out=1, in))
                pl.BlockSpec(memory_space=pltpu.MemorySpace.SMEM),   # bo scalar
            ],
            out_specs=pl.BlockSpec((None, 1, tile), lambda i: (i, 0, 0)),
        ),
        compiler_params=pltpu.CompilerParams(
            dimension_semantics=("parallel",),
        ),
    )(state, action, w0_s, w0_a, b0, w1, b1, wo, bo_smem)

    return q.reshape(n_tiles * tile, 1)[:B]


def init_critic_params(key, state_dim, action_dim, hidden_dims=(256, 256),
                       init_weight=0.003, dtype=jnp.float32):
    """Parameter init mirroring the PyTorch module.

    Hidden layers: nn.Linear default U(-1/sqrt(fan_in), 1/sqrt(fan_in));
    output layer: init_layer_uniform_ -> U(-0.003, 0.003).
    Hidden weights are stored pre-transposed as (in, out); the output weight
    keeps the PyTorch (out=1, in) layout and is used as a broadcast row.
    Pass dtype=jnp.bfloat16 for bf16 weights (kernel keeps f32 accumulation).
    """
    input_dim = state_dim + action_dim
    dims = [input_dim] + list(hidden_dims)
    params = []
    keys = jax.random.split(key, 2 * len(hidden_dims) + 2)
    ki = 0
    for d_in, d_out in zip(dims[:-1], dims[1:]):
        bound = 1.0 / float(d_in) ** 0.5
        w = jax.random.uniform(keys[ki], (d_in, d_out), dtype, -bound, bound); ki += 1
        b = jax.random.uniform(keys[ki], (1, d_out), dtype, -bound, bound); ki += 1
        params.extend([w, b])
    wo = jax.random.uniform(keys[ki], (1, dims[-1]), dtype, -init_weight, init_weight); ki += 1
    bo = jax.random.uniform(keys[ki], (1, 1), dtype, -init_weight, init_weight)
    params.extend([wo, bo])
    return tuple(params)


def critic_reference(state, action, params):
    """Pure-JAX reference (matches the PyTorch forward) for correctness checks."""
    w0, b0, w1, b1, wo, bo = params
    x = jnp.concatenate([state, action], axis=-1)
    h = jnp.maximum(x @ w0 + b0, 0.0)
    h = jnp.maximum(h @ w1 + b1, 0.0)
    return h @ wo.T + bo


if __name__ == "__main__":
    key = jax.random.PRNGKey(0)
    k_params, k_state, k_action = jax.random.split(key, 3)

    state_dim, action_dim = 24, 8
    hidden_dims = (256, 256)          # matches the PyTorch module default

    params = init_critic_params(k_params, state_dim, action_dim, hidden_dims)

    # Odd batch: exercises the ragged last block (no wrapper-side padding).
    batch = 37
    state = jax.random.normal(k_state, (batch, state_dim), jnp.float32)
    action = jax.random.normal(k_action, (batch, action_dim), jnp.float32)

    q = jax.block_until_ready(critic_forward(state, action, params))
    q_ref = critic_reference(state, action, params)
    assert q.shape == (batch, 1), q.shape
    assert jnp.allclose(q, q_ref, atol=1e-4, rtol=1e-4), (q, q_ref)

    # Multi-step grid with a ragged tail (forced small tile).
    k2s, k2a = jax.random.split(jax.random.PRNGKey(1))
    batch2 = 260
    state2 = jax.random.normal(k2s, (batch2, state_dim), jnp.float32)
    action2 = jax.random.normal(k2a, (batch2, action_dim), jnp.float32)
    q2 = jax.block_until_ready(critic_forward(state2, action2, params, batch_tile=128))
    q2_ref = critic_reference(state2, action2, params)
    assert q2.shape == (batch2, 1), q2.shape
    assert jnp.allclose(q2, q2_ref, atol=1e-4, rtol=1e-4), (q2, q2_ref)

    # TODO(synk): training-side pieces (Adam, clip_grad_norm_) are out of scope
    # for a forward-pass kernel.
    print("KERNEL_OK")
</pallas_src>

<mosaic_0001>
module attributes {stable_mosaic.version = 11 : i64} {
  func.func @critic_mlp_kernel(%arg0: i32, %arg1: memref<40x24xf32, #tpu.memory_space<vmem>>, %arg2: memref<40x8xf32, #tpu.memory_space<vmem>>, %arg3: memref<24x256xf32, #tpu.memory_space<vmem>>, %arg4: memref<8x256xf32, #tpu.memory_space<vmem>>, %arg5: memref<1x256xf32, #tpu.memory_space<vmem>>, %arg6: memref<256x256xf32, #tpu.memory_space<vmem>>, %arg7: memref<1x256xf32, #tpu.memory_space<vmem>>, %arg8: memref<1x256xf32, #tpu.memory_space<vmem>>, %arg9: memref<1xf32, #tpu.memory_space<smem>>, %arg10: memref<1x1x40xf32, #tpu.memory_space<vmem>>) attributes {dimension_semantics = [#tpu.dimension_semantics<parallel>], iteration_bounds = array<i64: 1>, scalar_prefetch = 0 : i64, scratch_operands = 0 : i64, tpu.core_type = #tpu.core_type<tc>, window_params = [{transform_indices = @transform_0, window_bounds = array<i64: 40, 24>}, {transform_indices = @transform_1, window_bounds = array<i64: 40, 8>}, {pipeline_mode = #tpu.pipeline_mode<synchronous>, transform_indices = @transform_2, window_bounds = array<i64: 24, 256>}, {pipeline_mode = #tpu.pipeline_mode<synchronous>, transform_indices = @transform_3, window_bounds = array<i64: 8, 256>}, {pipeline_mode = #tpu.pipeline_mode<synchronous>, transform_indices = @transform_4, window_bounds = array<i64: 1, 256>}, {pipeline_mode = #tpu.pipeline_mode<synchronous>, transform_indices = @transform_5, window_bounds = array<i64: 256, 256>}, {pipeline_mode = #tpu.pipeline_mode<synchronous>, transform_indices = @transform_6, window_bounds = array<i64: 1, 256>}, {pipeline_mode = #tpu.pipeline_mode<synchronous>, transform_indices = @transform_7, window_bounds = array<i64: 1, 256>}, {transform_indices = @transform_8, window_bounds = array<i64: 1>}, {transform_indices = @transform_9, window_bounds = array<i64: 1, 1, 40>}]} {
    %c0 = arith.constant 0 : index
    %c0_0 = arith.constant 0 : index
    %0 = vector.load %arg1[%c0, %c0_0] : memref<40x24xf32, #tpu.memory_space<vmem>>, vector<40x24xf32>
    %c0_1 = arith.constant 0 : index
    %c0_2 = arith.constant 0 : index
    %1 = vector.load %arg3[%c0_1, %c0_2] : memref<24x256xf32, #tpu.memory_space<vmem>>, vector<24x256xf32>
    %cst = arith.constant dense<0.000000e+00> : vector<40x256xf32>
    %2 = tpu.matmul %0, %1, %cst {dimension_numbers = #tpu.dot_dimension_numbers<[1], [0], [0], [1], [0, 0, 1, 1], [], []>} : vector<40x24xf32>, vector<24x256xf32>, vector<40x256xf32> -> vector<40x256xf32>
    %c0_3 = arith.constant 0 : index
    %c0_4 = arith.constant 0 : index
    %3 = vector.load %arg2[%c0_3, %c0_4] : memref<40x8xf32, #tpu.memory_space<vmem>>, vector<40x8xf32>
    %c0_5 = arith.constant 0 : index
    %c0_6 = arith.constant 0 : index
    %4 = vector.load %arg4[%c0_5, %c0_6] : memref<8x256xf32, #tpu.memory_space<vmem>>, vector<8x256xf32>
    %cst_7 = arith.constant dense<0.000000e+00> : vector<40x256xf32>
    %5 = tpu.matmul %3, %4, %cst_7 {dimension_numbers = #tpu.dot_dimension_numbers<[1], [0], [0], [1], [0, 0, 1, 1], [], []>} : vector<40x8xf32>, vector<8x256xf32>, vector<40x256xf32> -> vector<40x256xf32>
    %6 = arith.addf %2, %5 : vector<40x256xf32>
    %c0_8 = arith.constant 0 : index
    %c0_9 = arith.constant 0 : index
    %7 = vector.load %arg5[%c0_8, %c0_9] : memref<1x256xf32, #tpu.memory_space<vmem>>, vector<1x256xf32>
    %8 = vector.broadcast %7 : vector<1x256xf32> to vector<40x256xf32>
    %9 = arith.addf %6, %8 : vector<40x256xf32>
    %cst_10 = arith.constant 0.000000e+00 : f32
    %10 = vector.broadcast %cst_10 : f32 to vector<40x256xf32>
    %11 = arith.maximumf %9, %10 : vector<40x256xf32>
    %c0_11 = arith.constant 0 : index
    %c0_12 = arith.constant 0 : index
    %12 = vector.load %arg6[%c0_11, %c0_12] : memref<256x256xf32, #tpu.memory_space<vmem>>, vector<256x256xf32>
    %cst_13 = arith.constant dense<0.000000e+00> : vector<40x256xf32>
    %13 = tpu.matmul %11, %12, %cst_13 {dimension_numbers = #tpu.dot_dimension_numbers<[1], [0], [0], [1], [0, 0, 1, 1], [], []>} : vector<40x256xf32>, vector<256x256xf32>, vector<40x256xf32> -> vector<40x256xf32>
    %c0_14 = arith.constant 0 : index
    %c0_15 = arith.constant 0 : index
    %14 = vector.load %arg7[%c0_14, %c0_15] : memref<1x256xf32, #tpu.memory_space<vmem>>, vector<1x256xf32>
    %15 = vector.broadcast %14 : vector<1x256xf32> to vector<40x256xf32>
    %16 = arith.addf %13, %15 : vector<40x256xf32>
    %cst_16 = arith.constant 0.000000e+00 : f32
    %17 = vector.broadcast %cst_16 : f32 to vector<40x256xf32>
    %18 = arith.maximumf %16, %17 : vector<40x256xf32>
    %c0_17 = arith.constant 0 : index
    %c0_18 = arith.constant 0 : index
    %19 = vector.load %arg8[%c0_17, %c0_18] : memref<1x256xf32, #tpu.memory_space<vmem>>, vector<1x256xf32>
    %20 = vector.broadcast %19 : vector<1x256xf32> to vector<40x256xf32>
    %21 = arith.mulf %18, %20 : vector<40x256xf32>
    %cst_19 = arith.constant dense<0.000000e+00> : vector<40xf32>
    %22 = vector.multi_reduction <add>, %21, %cst_19 [1] : vector<40x256xf32> to vector<40xf32>
    %23 = vector.shape_cast %22 : vector<40xf32> to vector<40x1xf32>
    %c0_20 = arith.constant 0 : index
    %24 = memref.load %arg9[%c0_20] : memref<1xf32, #tpu.memory_space<smem>>
    %25 = vector.broadcast %24 : f32 to vector<40x1xf32>
    %26 = arith.addf %23, %25 : vector<40x1xf32>
    %27 = tpu.transpose %26, [1, 0] : vector<40x1xf32> -> vector<1x40xf32>
    %c0_21 = arith.constant 0 : index
    %c0_22 = arith.constant 0 : index
    %c0_23 = arith.constant 0 : index
    %28 = vector.load %arg10[%c0_21, %c0_22, %c0_23] : memref<1x1x40xf32, #tpu.memory_space<vmem>>, vector<1x1x40xf32>
    %29 = vector.shape_cast %28 : vector<1x1x40xf32> to vector<1x40xf32>
    %30 = vector.shape_cast %27 : vector<1x40xf32> to vector<1x1x40xf32>
    tpu.vector_store %arg10[%c0_21, %c0_22, %c0_23], %30 {strides = array<i32>} : memref<1x1x40xf32, #tpu.memory_space<vmem>>, vector<1x1x40xf32>,
    return
  }
  func.func @transform_0(%arg0: i32) -> (i32, i32) {
    %c0_i32 = arith.constant 0 : i32
    %c0_i32_0 = arith.constant 0 : i32
    return %arg0, %c0_i32 : i32, i32
  }
  func.func @transform_1(%arg0: i32) -> (i32, i32) {
    %c0_i32 = arith.constant 0 : i32
    %c0_i32_0 = arith.constant 0 : i32
    return %arg0, %c0_i32 : i32, i32
  }
  func.func @transform_2(%arg0: i32) -> (i32, i32) {
    %c0_i32 = arith.constant 0 : i32
    %c0_i32_0 = arith.constant 0 : i32
    %c0_i32_1 = arith.constant 0 : i32
    return %c0_i32, %c0_i32_0 : i32, i32
  }
  func.func @transform_3(%arg0: i32) -> (i32, i32) {
    %c0_i32 = arith.constant 0 : i32
    %c0_i32_0 = arith.constant 0 : i32
    %c0_i32_1 = arith.constant 0 : i32
    return %c0_i32, %c0_i32_0 : i32, i32
  }
  func.func @transform_4(%arg0: i32) -> (i32, i32) {
    %c0_i32 = arith.constant 0 : i32
    %c0_i32_0 = arith.constant 0 : i32
    %c0_i32_1 = arith.constant 0 : i32
    return %c0_i32, %c0_i32_0 : i32, i32
  }
  func.func @transform_5(%arg0: i32) -> (i32, i32) {
    %c0_i32 = arith.constant 0 : i32
    %c0_i32_0 = arith.constant 0 : i32
    %c0_i32_1 = arith.constant 0 : i32
    return %c0_i32, %c0_i32_0 : i32, i32
  }
  func.func @transform_6(%arg0: i32) -> (i32, i32) {
    %c0_i32 = arith.constant 0 : i32
    %c0_i32_0 = arith.constant 0 : i32
    %c0_i32_1 = arith.constant 0 : i32
    return %c0_i32, %c0_i32_0 : i32, i32
  }
  func.func @transform_7(%arg0: i32) -> (i32, i32) {
    %c0_i32 = arith.constant 0 : i32
    %c0_i32_0 = arith.constant 0 : i32
    %c0_i32_1 = arith.constant 0 : i32
    return %c0_i32, %c0_i32_0 : i32, i32
  }
  func.func @transform_8(%arg0: i32) -> i32 {
    %c0_i32 = arith.constant 0 : i32
    %c0_i32_0 = arith.constant 0 : i32
    return %c0_i32 : i32
  }
  func.func @transform_9(%arg0: i32) -> (i32, i32, i32) {
    %c0_i32 = arith.constant 0 : i32
    %c0_i32_0 = arith.constant 0 : i32
    %c0_i32_1 = arith.constant 0 : i32
    return %arg0, %c0_i32, %c0_i32_0 : i32, i32, i32
  }
}

</mosaic_0001>

<bundles_post_ra>
// kernel: tpu_custom_call.1
= control target key start
LH: loop header
LB: loop body
LE: loop exit
PB: predicated region body
PF: predicated region fallthrough
CT: control target
= control target key end

     0   :  { %15 = vsyncpa [#allocation4], 0  ;;  %s900_s0 = inlined_call_operand.vmem [shape: f32[37,24], index: 0, kind: input, shape index: {}]   ;;  %s901_s1 = inlined_call_operand.vmem [shape: f32[37,8], index: 1, kind: input, shape index: {}]   ;;  %s902_s2 = inlined_call_operand.vmem [shape: f32[24,256], index: 2, kind: input, shape index: {}]   ;;  %s903_s3 = inlined_call_operand.vmem [shape: f32[8,256], index: 3, kind: input, shape index: {}]   ;;  %s904_s4 = inlined_call_operand.vmem [shape: f32[1,256], index: 4, kind: input, shape index: {}]   ;;  %s905_s5 = inlined_call_operand.hbm [shape: f32[256,256], index: 5, kind: input, shape index: {}]   ;;  %s906_s6 = inlined_call_operand.vmem [shape: f32[1,256], index: 6, kind: input, shape index: {}]   ;;  %s907_s7 = inlined_call_operand.vmem [shape: f32[1,256], index: 7, kind: input, shape index: {}]   ;;  %s908_s8 = inlined_call_operand.<no memory space> [shape: f32[1], index: 8, kind: input, shape index: {}]   ;;  %s909_s9 = inlined_call_operand.hbm [shape: f32[1,1,40], index: 9, kind: output, shape index: {}]  }
   0x1   :  { %16 = vsyncpa [#allocation5], 0  ;;  %s735_s30 = smov [#allocation3]   ;;  %s687_s13 = scalar_lea.hbm %s905_s5, 8192 }
   0x2   :  { %s32_s10 = sshll.u32 %s735_s30, 4  ;;  %p688_p0 = scmp.ne.s32.totalorder %s905_s5, %s687_s13  ;;  %s33_s10 = int_to_ptr.vmem [resolvable:$true] %s32_s10 }
   0x3   :  { %p691_p1 = scmp.lt.u32.totalorder %s687_s13, %s905_s5 }
   0x5   :  { %p693_p2 = pnand %p691_p1, %p688_p0 }
   0x7   :  { %696 = shalt.err (!%p693_p2)
}
   0x8   :  { %s697_s18 = scalar_lea.vmem %s33_s10, 8192  ;;  %p702_p4 = scmp.lt.s32.totalorder %s33_s10, %s33_s10 }
   0x9   :  { %p698_p3 = scmp.ne.s32.totalorder %s33_s10, %s697_s18  ;;  %p703_p5 = scmp.lt.s32.totalorder %s697_s18, %s697_s18 }
   0xb   :  { %p704_p6 = por %p703_p5, %p702_p4 }
   0xd   :  { %p705_p7 = pnand %p704_p6, %p698_p3 }
   0xf   :  { %708 = shalt.err (!%p705_p7)
}
  0x10   :  { %s736_s19 = smov 256   ;;  %s737_s20 = smov 16  }
  0x11   :  { %38 = dma.hbm_to_vmem [thread:$0]  %s905_s5, 8192, %s33_s10, [#allocation4], %s736_s19, %s736_s19, %s737_s20  }
  0x12   :  { %731 = dma.done.wait [#allocation4], 8192  }
  0x13   :  { %732 = vsyncadd [#allocation4], 4294959104  ;;  %v738_v0 = vmov 0.0   ;;  %v65_v1 = vld [vmem:[%s903_s3 + $0x8] sm:$0xff]  ;;  %v64_v2 = vld [vmem:[%s903_s3] sm:$0xff]  ;;  %vm66_vm0 = vcmask 64512  }
  0x14   :  { %146 = vmatprep.mubr.f32.mxu0 %v738_v0  ;;  %v59_v3 = vld [vmem:[%s901_s1] sm:$0xff]  ;;  %82 = vmatprep.subr.mxu0 %v65_v1  ;;  %v54_v4 = vld [vmem:[%s902_s2 + $0x8] sm:$0xff]  ;;  %v56_v5 = vld [vmem:[%s902_s2 + $0x18] sm:$0xff]  ;;  %vm177_vm1 = vcmask 195584   ;;  %s739_s15 = smov [#allocation6]   ;;  %vm577_vm2 = vcmask 319488  }
  0x15   :  { %v53_v6 = vld [vmem:[%s902_s2] sm:$0xff]  ;;  %83 = vmatpush1.msra.mxu0 %v64_v2  ;;  %v604_v7 = vpack.c.bf16 %v56_v5, %v54_v4  ;;  %v55_v8 = vld [vmem:[%s902_s2 + $0x10] sm:$0xff]  ;;  %v58_v10 = vld [vmem:[%s902_s2 + $0x28] sm:$0xff]  ;;  %s585_s16 = sshll.u32 %s739_s15, 4  ;;  %s586_s16 = int_to_ptr.vmem [resolvable:$true] %s585_s16 }
  0x16   :  { %594 = vmatmul.mubr.msk.f32.vlgmr.msra.gmra.mrb[0].mxu0 %vm66_vm0, %v59_v3  ;;  %v606_v9 = vpack.c.bf16 %v55_v8, %v53_v6  ;;  %v60_v11 = vld [vmem:[%s901_s1 + $0x8] sm:$0xff]  ;;  %v57_v12 = vld [vmem:[%s902_s2 + $0x20] sm:$0xff]  ;;  %v61_v13 = vld [vmem:[%s901_s1 + $0x10] sm:$0xff]  ;;  %s713_s17 = scalar_lea.vmem %s586_s16, 32  ;;  %p714_p9 = scmp.lt.s32.totalorder %s586_s16, %s586_s16 }
  0x17   :  { %605 = vmatprep.subr.bf16.mxu0 %v604_v7  ;;  %152 = vmatprep.mubr.f32.mxu0 %v738_v0  ;;  %v321_v14 = vld [vmem:[#allocation3 + $0x8] sm:$0xff]  ;;  %v323_v15 = vld [vmem:[#allocation3 + $0x18] sm:$0xff]  ;;  %v320_v16 = vld [vmem:[#allocation3] sm:$0xff] }
  0x18   :  { %607 = vmatpush1.bf16.msra.mxu0 %v606_v9  ;;  %v608_v17 = vpack.c.bf16 %v323_v15, %v321_v14  ;;  %v322_v18 = vld [vmem:[#allocation3 + $0x10] sm:$0xff]  ;;  %v325_v19 = vld [vmem:[#allocation3 + $0x28] sm:$0xff]  ;;  %v327_v20 = vld [vmem:[#allocation3 + $0x38] sm:$0xff] }
  0x19   :  { %197 = vmatprep.subr.mxu0 %v58_v10  ;;  %v610_v21 = vpack.c.bf16 %v322_v18, %v320_v16  ;;  %v612_v22 = vpack.c.bf16 %v327_v20, %v325_v19  ;;  %v324_v23 = vld [vmem:[#allocation3 + $0x20] sm:$0xff]  ;;  %v326_v24 = vld [vmem:[#allocation3 + $0x30] sm:$0xff]  ;;  %v329_v25 = vld [vmem:[#allocation3 + $0x48] sm:$0xff] }
  0x1a   :  { %595 = vmatmul.mubr.msk.f32.gmra.mrb[2].mxu0 %vm66_vm0, %v60_v11  ;;  %609 = vmatprep.subr.bf16.mxu1 %v608_v17  ;;  %v331_v26 = vld [vmem:[#allocation3 + $0x58] sm:$0xff]  ;;  %v614_v27 = vpack.c.bf16 %v326_v24, %v324_v23  ;;  %v328_v29 = vld [vmem:[#allocation3 + $0x40] sm:$0xff]  ;;  %v330_v30 = vld [vmem:[#allocation3 + $0x50] sm:$0xff] }
  0x1b   :  { %158 = vmatprep.mubr.f32.mxu0 %v738_v0  ;;  %611 = vmatpush1.bf16.msra.mxu1 %v610_v21  ;;  %v616_v28 = vpack.c.bf16 %v331_v26, %v329_v25  ;;  %v62_v31 = vld [vmem:[%s901_s1 + $0x18] sm:$0xff]  ;;  %v333_v32 = vld [vmem:[#allocation3 + $0x68] sm:$0xff]  ;;  %v618_v34 = vpack.c.bf16 %v330_v30, %v328_v29  ;;  %v332_v36 = vld [vmem:[#allocation3 + $0x60] sm:$0xff] }
  0x1c   :  { %198 = vmatpush1.msra.mxu0 %v57_v12  ;;  %613 = vmatprep.subr.bf16.mxu1 %v612_v22  ;;  %v335_v33 = vld [vmem:[#allocation3 + $0x78] sm:$0xff]  ;;  %v334_v37 = vld [vmem:[#allocation3 + $0x70] sm:$0xff]  ;;  %v63_v38 = vld [vmem:[%s901_s1 + $0x20] sm:$0xff] }
  0x1d   :  { %v620_v35 = vpack.c.bf16 %v335_v33, %v333_v32  ;;  %v337_v39 = vld [vmem:[#allocation3 + $0x88] sm:$0xff]  ;;  %v339_v40 = vld [vmem:[#allocation3 + $0x98] sm:$0xff]  ;;  %v622_v41 = vpack.c.bf16 %v334_v37, %v332_v36  ;;  %v336_v43 = vld [vmem:[#allocation3 + $0x80] sm:$0xff] }
  0x1e   :  { %596 = vmatmul.mubr.msk.f32.gmra.mrb[4].mxu0 %vm66_vm0, %v61_v13  ;;  %v624_v42 = vpack.c.bf16 %v339_v40, %v337_v39  ;;  %v338_v44 = vld [vmem:[#allocation3 + $0x90] sm:$0xff]  ;;  %v48_v45 = vld [vmem:[%s900_s0] sm:$0xff]  ;;  %v341_v46 = vld [vmem:[#allocation3 + $0xa8] sm:$0xff] }
  0x1f   :  { %164 = vmatprep.mubr.f32.mxu0 %v738_v0  ;;  %615 = vmatpush1.bf16.msra.mxu1 %v614_v27  ;;  %v343_v47 = vld [vmem:[#allocation3 + $0xb8] sm:$0xff]  ;;  %v626_v48 = vpack.c.bf16 %v338_v44, %v336_v43  ;;  %v340_v50 = vld [vmem:[#allocation3 + $0xa0] sm:$0xff]  ;;  %v342_v51 = vld [vmem:[#allocation3 + $0xb0] sm:$0xff] }
  0x20   :  { %617 = vmatprep.subr.bf16.mxu1 %v616_v28  ;;  %v628_v49 = vpack.c.bf16 %v343_v47, %v341_v46  ;;  %v49_v52 = vld [vmem:[%s900_s0 + $0x8] sm:$0xff]  ;;  %v347_v54 = vld [vmem:[#allocation3 + $0xd8] sm:$0xff]  ;;  %v630_v55 = vpack.c.bf16 %v342_v51, %v340_v50  ;;  %v344_v57 = vld [vmem:[#allocation3 + $0xc0] sm:$0xff] }
  0x21   :  { %v345_v53 = vld [vmem:[#allocation3 + $0xc8] sm:$0xff]  ;;  %v346_v58 = vld [vmem:[#allocation3 + $0xd0] sm:$0xff]  ;;  %v351_v61 = vld [vmem:[#allocation3 + $0xf8] sm:$0xff] }
  0x22   :  { %597 = vmatmul.mubr.msk.f32.gmra.mrb[6].mxu0 %vm66_vm0, %v62_v31  ;;  %v632_v56 = vpack.c.bf16 %v347_v54, %v345_v53  ;;  %v50_v59 = vld [vmem:[%s900_s0 + $0x10] sm:$0xff]  ;;  %v349_v60 = vld [vmem:[#allocation3 + $0xe8] sm:$0xff]  ;;  %v634_v62 = vpack.c.bf16 %v346_v58, %v344_v57  ;;  %v348_v1 = vld [vmem:[#allocation3 + $0xe0] sm:$0xff]  ;;  %v290_v53 = vlaneseq }
  0x23   :  { %170 = vmatprep.mubr.f32.mxu0 %v738_v0  ;;  %619 = vmatpush1.bf16.msra.mxu1 %v618_v34  ;;  %v636_v63 = vpack.c.bf16 %v351_v61, %v349_v60  ;;  %v350_v2 = vld [vmem:[#allocation3 + $0xf0] sm:$0xff]  ;;  %v51_v3 = vld [vmem:[%s900_s0 + $0x18] sm:$0xff]  ;;  %v353_v4 = vld [vmem:[#allocation3 + $0x108] sm:$0xff] }
  0x24   :  { %621 = vmatprep.subr.bf16.mxu1 %v620_v35  ;;  %v355_v5 = vld [vmem:[#allocation3 + $0x118] sm:$0xff]  ;;  %v638_v6 = vpack.c.bf16 %v350_v2, %v348_v1  ;;  %v352_v8 = vld [vmem:[#allocation3 + $0x100] sm:$0xff]  ;;  %v354_v9 = vld [vmem:[#allocation3 + $0x110] sm:$0xff]  ;;  %v291_v54 = vshrl.u32 %v290_v53, 7 }
  0x25   :  { %v640_v7 = vpack.c.bf16 %v355_v5, %v353_v4  ;;  %v52_v10 = vld [vmem:[%s900_s0 + $0x20] sm:$0xff]  ;;  %v357_v11 = vld [vmem:[#allocation3 + $0x128] sm:$0xff]  ;;  %v359_v12 = vld [vmem:[#allocation3 + $0x138] sm:$0xff]  ;;  %v642_v13 = vpack.c.bf16 %v354_v9, %v352_v8 }
  0x26   :  { %598 = vmatmul.mubr.msk.f32.gmra.mrb[8].mxu0 %vm66_vm0, %v63_v38  ;;  %v644_v14 = vpack.c.bf16 %v359_v12, %v357_v11  ;;  %v356_v15 = vld [vmem:[#allocation3 + $0x120] sm:$0xff]  ;;  %v358_v16 = vld [vmem:[#allocation3 + $0x130] sm:$0xff]  ;;  %v361_v17 = vld [vmem:[#allocation3 + $0x148] sm:$0xff]  ;;  %v296_v57 = vsub.s32 1, %v291_v54 }
  0x27   :  { %257 = vmatprep.mubr.f32.mxu0 %v738_v0  ;;  %623 = vmatpush1.bf16.msra.mxu1 %v622_v41  ;;  %v363_v18 = vld [vmem:[#allocation3 + $0x158] sm:$0xff]  ;;  %v646_v19 = vpack.c.bf16 %v358_v16, %v356_v15  ;;  %v360_v20 = vld [vmem:[#allocation3 + $0x140] sm:$0xff]  ;;  %v362_v21 = vld [vmem:[#allocation3 + $0x150] sm:$0xff] }
  0x28   :  { %625 = vmatprep.subr.bf16.mxu1 %v624_v42  ;;  %v365_v22 = vld [vmem:[#allocation3 + $0x168] sm:$0xff]  ;;  %v367_v23 = vld [vmem:[#allocation3 + $0x178] sm:$0xff]  ;;  %v650_v24 = vpack.c.bf16 %v362_v21, %v360_v20  ;;  %v364_v26 = vld [vmem:[#allocation3 + $0x160] sm:$0xff] }
  0x29   :  { %v652_v25 = vpack.c.bf16 %v367_v23, %v365_v22  ;;  %v366_v27 = vld [vmem:[#allocation3 + $0x170] sm:$0xff]  ;;  %v369_v28 = vld [vmem:[#allocation3 + $0x188] sm:$0xff]  ;;  %v371_v29 = vld [vmem:[#allocation3 + $0x198] sm:$0xff] }
  0x2a   :  { %599 = vmatmul.mubr.msk.f32.vlgmr.msra.gmra.mrb[0].mxu0 %vm177_vm1, %v48_v45  ;;  %v654_v30 = vpack.c.bf16 %v366_v27, %v364_v26  ;;  %v656_v31 = vpack.c.bf16 %v371_v29, %v369_v28  ;;  %v368_v32 = vld [vmem:[#allocation3 + $0x180] sm:$0xff]  ;;  %v370_v33 = vld [vmem:[#allocation3 + $0x190] sm:$0xff]  ;;  %v373_v34 = vld [vmem:[#allocation3 + $0x1a8] sm:$0xff] }
  0x2b   :  { %263 = vmatprep.mubr.f32.mxu0 %v738_v0  ;;  %627 = vmatpush1.bf16.msra.mxu1 %v626_v48  ;;  %v375_v35 = vld [vmem:[#allocation3 + $0x1b8] sm:$0xff]  ;;  %v658_v36 = vpack.c.bf16 %v370_v33, %v368_v32  ;;  %v372_v38 = vld [vmem:[#allocation3 + $0x1a0] sm:$0xff]  ;;  %v374_v39 = vld [vmem:[#allocation3 + $0x1b0] sm:$0xff] }
  0x2c   :  { %629 = vmatprep.subr.bf16.mxu1 %v628_v49  ;;  %v660_v37 = vpack.c.bf16 %v375_v35, %v373_v34  ;;  %v377_v40 = vld [vmem:[#allocation3 + $0x1c8] sm:$0xff]  ;;  %v379_v41 = vld [vmem:[#allocation3 + $0x1d8] sm:$0xff]  ;;  %v662_v42 = vpack.c.bf16 %v374_v39, %v372_v38  ;;  %v376_v44 = vld [vmem:[#allocation3 + $0x1c0] sm:$0xff] }
  0x2d   :  { %v664_v43 = vpack.c.bf16 %v379_v41, %v377_v40  ;;  %v378_v45 = vld [vmem:[#allocation3 + $0x1d0] sm:$0xff]  ;;  %v381_v47 = vld [vmem:[#allocation3 + $0x1e8] sm:$0xff]  ;;  %v383_v48 = vld [vmem:[#allocation3 + $0x1f8] sm:$0xff] }
  0x2e   :  { %600 = vmatmul.mubr.msk.f32.gmra.mrb[2].mxu0 %vm177_vm1, %v49_v52  ;;  %v666_v46 = vpack.c.bf16 %v378_v45, %v376_v44  ;;  %v668_v49 = vpack.c.bf16 %v383_v48, %v381_v47  ;;  %v380_v50 = vld [vmem:[#allocation3 + $0x1e0] sm:$0xff]  ;;  %v382_v51 = vld [vmem:[#allocation3 + $0x1f0] sm:$0xff] }
  0x2f   :  { %269 = vmatprep.mubr.f32.mxu0 %v738_v0  ;;  %631 = vmatpush1.bf16.msra.mxu1 %v630_v55  ;;  %v670_v52 = vpack.c.bf16 %v382_v51, %v380_v50  ;;  %v292_v55 = vsub.s32 0, %v291_v54  ;;  %v384_v26 = vld [vmem:[%s906_s6] sm:$0x3] }
  0x30   :  { %633 = vmatprep.subr.bf16.mxu1 %v632_v56  ;;  %v288_v56 = vld [vmem:[%s904_s4] sm:$0x3]  ;;  %v393_v28 = vrot.slane %v384_v26, %v296_v57 }
  0x31   :  { %v293_v58 = vrot.slane %v288_v56, %v292_v55  ;;  %v389_v27 = vrot.slane %v384_v26, %v292_v55  ;;  %v501_v29 = vld [vmem:[%s907_s7] sm:$0x3] }
  0x32   :  { %601 = vmatmul.mubr.msk.f32.gmra.mrb[4].mxu0 %vm177_vm1, %v50_v59  ;;  %v297_v59 = vrot.slane %v288_v56, %v296_v57  ;;  %v506_v33 = vrot.slane %v501_v29, %v292_v55  ;;  %v510_v35 = vrot.slane %v501_v29, %v296_v57 }
  0x33   :  { %275 = vmatprep.mubr.f32.mxu0 %v738_v0  ;;  %635 = vmatpush1.bf16.msra.mxu1 %v634_v62 }
  0x34   :  { %637 = vmatprep.subr.bf16.mxu1 %v636_v63 }
  0x36   :  { %602 = vmatmul.mubr.msk.f32.gmra.mrb[6].mxu0 %vm177_vm1, %v51_v3 }
  0x37   :  { %281 = vmatprep.mubr.f32.mxu0 %v738_v0  ;;  %639 = vmatpush1.bf16.msra.mxu1 %v638_v6  ;;  %v648_v0 = vpack.c.bf16 %v363_v18, %v361_v17 }
  0x38   :  { %641 = vmatprep.subr.bf16.mxu1 %v640_v7 }
  0x3a   :  { %603 = vmatmul.mubr.msk.f32.gmra.mrb[8].mxu0 %vm177_vm1, %v52_v10 }
  0x3b   :  { %643 = vmatpush1.bf16.msra.mxu1 %v642_v13 }
  0x3c   :  { %645 = vmatprep.subr.bf16.mxu1 %v644_v14 }
  0x3f   :  { %647 = vmatpush1.bf16.msra.mxu1 %v646_v19 }
  0x40   :  { %649 = vmatprep.subr.bf16.mxu1 %v648_v0 }
  0x43   :  { %651 = vmatpush1.bf16.msra.mxu1 %v650_v24 }
  0x44   :  { %653 = vmatprep.subr.bf16.mxu1 %v652_v25 }
  0x47   :  { %655 = vmatpush1.bf16.msra.mxu1 %v654_v30 }
  0x48   :  { %657 = vmatprep.subr.bf16.mxu1 %v656_v31 }
  0x4b   :  { %659 = vmatpush1.bf16.msra.mxu1 %v658_v36 }
  0x4c   :  { %661 = vmatprep.subr.bf16.mxu1 %v660_v37 }
  0x4f   :  { %663 = vmatpush1.bf16.msra.mxu1 %v662_v42 }
  0x50   :  { %665 = vmatprep.subr.bf16.mxu1 %v664_v43 }
  0x53   :  { %667 = vmatpush1.bf16.msra.mxu1 %v666_v46 }
  0x54   :  { %669 = vmatprep.subr.bf16.mxu1 %v668_v49 }
  0x57   :  { %671 = vmatpush1.bf16.msra.mxu1 %v670_v52 }
  0xfd   :  { %v259_v60 = vpop.f32.mrb[0].mxu0 }
  0xfe   :  { %v300_v61 = vadd.f32 %v293_v58, %v259_v60  ;;  %v261_v62 = vpop.f32.mrb[1].mxu0 }
  0xff   :  { %v301_v63 = vadd.f32 %v297_v59, %v261_v62 }
 0x100   :  { %v310_v3 = vmax.f32 %v300_v61, 0.0 }
 0x101   :  { %v265_v1 = vpop.f32.mrb[2].mxu0  ;;  %v311_v2 = vmax.f32 %v301_v63, 0.0 }
 0x102   :  { %v302_v4 = vadd.f32 %v293_v58, %v265_v1  ;;  %v267_v5 = vpop.f32.mrb[3].mxu0 }
 0x103   :  { %v303_v6 = vadd.f32 %v297_v59, %v267_v5  ;;  %460 = vmatprep.mubr.f32.mxu1 %v311_v2 }
 0x104   :  { %461 = vmatmul.mubr.f32.vlgmr.msra.gmra.mrb[0].mxu1 %v310_v3  ;;  %v312_v9 = vmax.f32 %v302_v4, 0.0 }
 0x105   :  { %v313_v7 = vmax.f32 %v303_v6, 0.0  ;;  %v271_v8 = vpop.f32.mrb[4].mxu0 }
 0x106   :  { %v304_v10 = vadd.f32 %v293_v58, %v271_v8  ;;  %v273_v11 = vpop.f32.mrb[5].mxu0 }
 0x107   :  { %v305_v12 = vadd.f32 %v297_v59, %v273_v11  ;;  %466 = vmatprep.mubr.f32.mxu1 %v313_v7 }
 0x108   :  { %467 = vmatmul.mubr.f32.gmra.mrb[2].mxu1 %v312_v9  ;;  %v314_v15 = vmax.f32 %v304_v10, 0.0 }
 0x109   :  { %v315_v13 = vmax.f32 %v305_v12, 0.0  ;;  %v277_v14 = vpop.f32.mrb[6].mxu0 }
 0x10a   :  { %v306_v16 = vadd.f32 %v293_v58, %v277_v14  ;;  %v279_v17 = vpop.f32.mrb[7].mxu0  ;;  %v539_v14 = vstv %s908_s8  ;;  %s709_s8 = scalar_lea.vmem %s586_s16, 16 }
 0x10b   :  { %v307_v18 = vadd.f32 %v297_v59, %v279_v17  ;;  %472 = vmatprep.mubr.f32.mxu1 %v315_v13  ;;  %p710_p8 = scmp.ne.s32.totalorder %s586_s16, %s709_s8  ;;  %p715_p10 = scmp.lt.s32.totalorder %s713_s17, %s709_s8 }
 0x10c   :  { %473 = vmatmul.mubr.f32.gmra.mrb[4].mxu1 %v314_v15  ;;  %v316_v20 = vmax.f32 %v306_v16, 0.0 }
 0x10d   :  { %v317_v19 = vmax.f32 %v307_v18, 0.0  ;;  %v283_v0 = vpop.f32.mrb[8].mxu0  ;;  %p716_p11 = por %p715_p10, %p714_p9 }
 0x10e   :  { %v308_v21 = vadd.f32 %v293_v58, %v283_v0  ;;  %v285_v22 = vpop.f32.mrb[9].mxu0 }
 0x10f   :  { %v309_v23 = vadd.f32 %v297_v59, %v285_v22  ;;  %478 = vmatprep.mubr.f32.mxu1 %v317_v19  ;;  %p717_p12 = pnand %p716_p11, %p710_p8 }
 0x110   :  { %479 = vmatmul.mubr.f32.gmra.mrb[6].mxu1 %v316_v20  ;;  %v318_v25 = vmax.f32 %v308_v21, 0.0 }
 0x111   :  { %v319_v24 = vmax.f32 %v309_v23, 0.0 }
 0x113   :  { %484 = vmatprep.mubr.f32.mxu1 %v319_v24 }
 0x114   :  { %485 = vmatmul.mubr.f32.gmra.mrb[8].mxu1 %v318_v25 }
 0x1d7   :  { %v462_v30 = vpop.f32.mrb[0].mxu1 }
 0x1d8   :  { %v463_v31 = vadd.f32 %v462_v30, %v389_v27  ;;  %v464_v32 = vpop.f32.mrb[1].mxu1 }
 0x1d9   :  { %v465_v34 = vadd.f32 %v464_v32, %v393_v28 }
 0x1da   :  { %v491_v36 = vmax.f32 %v463_v31, 0.0 }
 0x1db   :  { %v492_v37 = vmax.f32 %v465_v34, 0.0  ;;  %v468_v38 = vpop.f32.mrb[2].mxu1 }
 0x1dc   :  { %v469_v39 = vadd.f32 %v468_v38, %v389_v27  ;;  %v470_v40 = vpop.f32.mrb[3].mxu1  ;;  %v513_v41 = vmul.f32 %v506_v33, %v491_v36 }
 0x1dd   :  { %v471_v42 = vadd.f32 %v470_v40, %v393_v28  ;;  %v514_v43 = vmul.f32 %v510_v35, %v492_v37 }
 0x1de   :  { %v493_v44 = vmax.f32 %v469_v39, 0.0 }
 0x1df   :  { %v494_v45 = vmax.f32 %v471_v42, 0.0  ;;  %v474_v46 = vpop.f32.mrb[4].mxu1  ;;  %v523_v47 = vadd.f32 %v514_v43, %v513_v41 }
 0x1e0   :  { %v515_v48 = vmul.f32 %v506_v33, %v493_v44  ;;  %v475_v49 = vadd.f32 %v474_v46, %v389_v27  ;;  %v476_v50 = vpop.f32.mrb[5].mxu1 }
 0x1e1   :  { %v516_v51 = vmul.f32 %v510_v35, %v494_v45  ;;  %v477_v52 = vadd.f32 %v476_v50, %v393_v28  ;;  %524 = vadd.xlane.f32.xlu0 %v523_v47 }
 0x1e2   :  { %v495_v53 = vmax.f32 %v475_v49, 0.0 }
 0x1e3   :  { %v496_v54 = vmax.f32 %v477_v52, 0.0  ;;  %v480_v55 = vpop.f32.mrb[6].mxu1  ;;  %v526_v56 = vadd.f32 %v516_v51, %v515_v48 }
 0x1e4   :  { %v481_v57 = vadd.f32 %v480_v55, %v389_v27  ;;  %v482_v58 = vpop.f32.mrb[7].mxu1  ;;  %v517_v59 = vmul.f32 %v506_v33, %v495_v53 }
 0x1e5   :  { %v483_v60 = vadd.f32 %v482_v58, %v393_v28  ;;  %527 = vadd.xlane.f32.xlu0 %v526_v56  ;;  %v518_v61 = vmul.f32 %v510_v35, %v496_v54 }
 0x1e6   :  { %v497_v62 = vmax.f32 %v481_v57, 0.0 }
 0x1e7   :  { %v498_v63 = vmax.f32 %v483_v60, 0.0  ;;  %v486_v1 = vpop.f32.mrb[8].mxu1  ;;  %v529_v2 = vadd.f32 %v518_v61, %v517_v59 }
 0x1e8   :  { %v519_v3 = vmul.f32 %v506_v33, %v497_v62  ;;  %v487_v4 = vadd.f32 %v486_v1, %v389_v27  ;;  %v488_v5 = vpop.f32.mrb[9].mxu1 }
 0x1e9   :  { %v520_v6 = vmul.f32 %v510_v35, %v498_v63  ;;  %v489_v7 = vadd.f32 %v488_v5, %v393_v28  ;;  %530 = vadd.xlane.f32.xlu1 %v529_v2 }
 0x1ea   :  { %v499_v8 = vmax.f32 %v487_v4, 0.0 }
 0x1eb   :  { %v500_v9 = vmax.f32 %v489_v7, 0.0  ;;  %v532_v10 = vadd.f32 %v520_v6, %v519_v3 }
 0x1ec   :  { %v521_v11 = vmul.f32 %v506_v33, %v499_v8 }
 0x1ed   :  { %v522_v12 = vmul.f32 %v510_v35, %v500_v9  ;;  %533 = vadd.xlane.f32.xlu1 %v532_v10 }
 0x1ef   :  { %v535_v13 = vadd.f32 %v522_v12, %v521_v11 }
 0x1f1   :  { %536 = vadd.xlane.f32.xlu0 %v535_v13 }
 0x26e   :  { %v525_v15 = vpop.xlane.xlu0 %524 }
 0x26f   :  { %v540_v16 = vadd.f32 %v539_v14, %v525_v15 }
 0x271   :  { %545 = vxpose.xlu1.b32.start [1/5] (short) (narrow) %v540_v16, 8 }
 0x272   :  { %v528_v17 = vpop.xlane.xlu0 %527 }
 0x273   :  { %v541_v18 = vadd.f32 %v539_v14, %v528_v17 }
 0x275   :  { %546 = vxpose.xlu1.b32.cont [2/5] (short) (narrow) %v541_v18, 8 }
 0x276   :  { %v531_v19 = vpop.xlane.xlu1 %530 }
 0x277   :  { %v542_v0 = vadd.f32 %v539_v14, %v531_v19 }
 0x279   :  { %547 = vxpose.xlu1.b32.cont [3/5] (short) (narrow) %v542_v0, 8 }
 0x27a   :  { %v534_v20 = vpop.xlane.xlu1 %533 }
 0x27b   :  { %v543_v21 = vadd.f32 %v539_v14, %v534_v20 }
 0x27d   :  { %548 = vxpose.xlu1.b32.cont [4/5] (short) (narrow) %v543_v21, 8 }
 0x27e   :  { %v537_v22 = vpop.xlane.xlu0 %536 }
 0x27f   :  { %v544_v23 = vadd.f32 %v539_v14, %v537_v22 }
 0x281   :  { %549 = vxpose.xlu1.b32.end [5/5] (short) (narrow) %v544_v23, 8 }
 0x2f1   :  { %v561_v24 = vpop.trf.xlu1 }
 0x2f2   :  { %578 = vst.msk [vmem:[#allocation6] sm:$0x1] %vm577_vm2, %v561_v24 }
 0x2f3   :  { %720 = shalt.err (!%p717_p12)
}
 0x2f4   :  { %s721_s20 = scalar_lea.hbm %s909_s9, 16 }
 0x2f5   :  { %p722_p13 = scmp.ne.s32.totalorder %s909_s9, %s721_s20  ;;  %p725_p0 = scmp.lt.u32.totalorder %s721_s20, %s909_s9 }
 0x2f7   :  { %p727_p1 = pnand %p725_p0, %p722_p13 }
 0x2f9   :  { %730 = shalt.err (!%p727_p1)
}
 0x2fa   :  { %588 = dma.vmem_to_hbm [thread:$0]  %s586_s16, 16, %s909_s9, [#allocation5]  }
 0x2fb   :  { %733 = dma.done.wait [#allocation5], 16  }
 0x2fc   :  { %734 = vsyncadd [#allocation5], 4294967280 }
 0x2fd   :  { %592 = vsyncpa [#allocation4], 1 }
 0x2fe   :  { %593 = vsyncpa [#allocation5], 1 }

</bundles_post_ra>
